<compile_context>
chip_gen: v5e
topology: v5e:2x2
jax: 0.10.0
libtpu: 0.0.40
codegen_flags: <defaults>
</compile_context>

<pallas_src>
import functools

import jax
import jax.numpy as jnp
import numpy as np
from jax import lax
from jax.experimental import pallas as pl
from jax.experimental.pallas import tpu as pltpu


# -----------------------------------------------------------------------------
# Pallas kernel: SSD matching for a block of Bc batch items
# -----------------------------------------------------------------------------
def _match_kernel(targets_ref, priors_ref, conf_ref, *, threshold):
    # targets_ref : (Bc, O, 5) f32  GT boxes (point form) + label column
    # priors_ref  : (1, 8, Pp) f32  rows: pxmin, pymin, pxmax, pymax, area_p, 0,0,0
    # conf_ref    : (Bc, 1, Pp) i32 matched class (+1), 0 = background
    Bc, O, _ = targets_ref.shape
    Pp = priors_ref.shape[2]

    t = targets_ref[...]
    txmin = t[:, :, 0:1]                         # (Bc, O, 1)
    tymin = t[:, :, 1:2]
    txmax = t[:, :, 2:3]
    tymax = t[:, :, 3:4]
    labels_i = t[:, :, 4:5].astype(jnp.int32)    # (Bc, O, 1)

    pr = priors_ref[...]                         # (1, 8, Pp) — batch-invariant
    pxmin = pr[:, 0:1, :]                        # (1, 1, Pp)
    pymin = pr[:, 1:2, :]
    pxmax = pr[:, 2:3, :]
    pymax = pr[:, 3:4, :]
    area_p = pr[:, 4:5, :]

    # --- jaccard / IoU matrix, (Bc, O, Pp) ------------------------------------
    iw = jnp.maximum(jnp.minimum(txmax, pxmax) - jnp.maximum(txmin, pxmin), 0.0)
    ih = jnp.maximum(jnp.minimum(tymax, pymax) - jnp.maximum(tymin, pymin), 0.0)
    inter = iw * ih
    area_t = (txmax - txmin) * (tymax - tymin)   # (Bc, O, 1)
    overlaps = inter / (area_t + area_p - inter)

    # Broadcast iotas — never materialize full (O, Pp) index planes.
    obj_idx = lax.broadcasted_iota(jnp.int32, (1, O, 1), 1)   # (1, O, 1)
    pri_idx = lax.broadcasted_iota(jnp.int32, (1, 1, Pp), 2)  # (1, 1, Pp)
    BIG = jnp.int32(2 ** 30)

    # --- best truth per prior (reduce over objects, axis=1) -------------------
    bto = jnp.max(overlaps, axis=1, keepdims=True)                    # (Bc, 1, Pp)
    bti = jnp.min(jnp.where(overlaps >= bto, obj_idx, BIG),
                  axis=1, keepdims=True)                              # (Bc, 1, Pp)

    # --- best prior per truth (reduce over priors, axis=2), first-index ties --
    bpo = jnp.max(overlaps, axis=2, keepdims=True)                    # (Bc, O, 1)
    bpi = jnp.min(jnp.where(overlaps >= bpo, pri_idx, BIG),
                  axis=2, keepdims=True)                              # (Bc, O, 1)

    # --- forced matching (fused): index_fill_(bpi, 2) + "bti[bpi[j]] = j" -----
    # last-j-wins, exactly like the torch loop.
    forced_j = jnp.max(jnp.where(pri_idx == bpi, obj_idx, -1),
                       axis=1, keepdims=True)                         # (Bc, 1, Pp)
    forced = forced_j >= 0
    bto = jnp.where(forced, 2.0, bto)
    bti = jnp.where(forced, forced_j, bti)

    # --- conf = labels[best_truth_idx] + 1 via integer select-sum gather ------
    conf = jnp.sum(jnp.where(bti == obj_idx, labels_i + 1, 0),
                   axis=1, keepdims=True)                             # (Bc, 1, Pp)
    conf = jnp.where(bto < threshold, 0, conf)
    conf_ref[...] = conf


# -----------------------------------------------------------------------------
# Wrapper: prior precompute, padding, pallas_call
# -----------------------------------------------------------------------------
def precompute_prior_features(priors):
    """(P, 4) center-size -> (1, 8, Pp) [pxmin, pymin, pxmax, pymax, area, 0,0,0].

    P is padded to a multiple of 128 (lane-dense stores / tile-aligned
    intermediates). Padded priors are degenerate far-away boxes with zero
    area: overlap is exactly 0 and the first-index tie-break keeps them from
    ever stealing a forced match from a real prior.
    """
    P = priors.shape[0]
    Pp = ((P + 127) // 128) * 128
    p_pt = jnp.concatenate([priors[:, :2] - priors[:, 2:] * 0.5,
                            priors[:, :2] + priors[:, 2:] * 0.5], axis=1)  # (P, 4)
    area = (p_pt[:, 2] - p_pt[:, 0]) * (p_pt[:, 3] - p_pt[:, 1])           # (P,)
    feat = jnp.concatenate(
        [p_pt, area[:, None], jnp.zeros((P, 3), p_pt.dtype)], axis=1)      # (P, 8)
    if Pp != P:
        pad = jnp.full((Pp - P, 8), -10.0, dtype=feat.dtype)
        pad = pad.at[:, 4:].set(0.0)
        feat = jnp.concatenate([feat, pad], axis=0)
    return feat.T[None]                                                    # (1, 8, Pp)


def pallas_match(targets, prior_feat, *, threshold, block_b=8):
    """targets: (B, O, 5) f32, prior_feat: (1, 8, Pp) f32 -> conf (B, Pp) int32."""
    B, O, _ = targets.shape
    Pp = prior_feat.shape[-1]
    Bc = min(block_b, B)
    nb = pl.cdiv(B, Bc)
    Bp = nb * Bc
    if Bp != B:
        # Explicit zero-pad of the batch so every grid step sees a full block.
        targets = jnp.pad(targets, ((0, Bp - B), (0, 0), (0, 0)))

    conf = pl.pallas_call(
        functools.partial(_match_kernel, threshold=float(threshold)),
        out_shape=jax.ShapeDtypeStruct((Bp, 1, Pp), jnp.int32),
        grid=(nb,),
        in_specs=[
            # One DMA per step: boxes + labels together.
            pl.BlockSpec((Bc, O, 5), lambda b: (b, 0, 0)),
            # Batch-invariant priors: constant index_map -> stays resident.
            pl.BlockSpec((1, 8, Pp), lambda b: (0, 0, 0)),
        ],
        out_specs=pl.BlockSpec((Bc, 1, Pp), lambda b: (b, 0, 0)),
        compiler_params=pltpu.CompilerParams(
            # Splits batch blocks across TensorCores on v7x; no-op on v5e/v6e.
            dimension_semantics=("parallel",)),
    )(targets, prior_feat)
    return conf[:B, 0, :]                                                  # (B, Pp)


# -----------------------------------------------------------------------------
# Jitted end-to-end forward with fixed-capacity positive compaction
# -----------------------------------------------------------------------------
@functools.partial(jax.jit, static_argnames=("threshold", "max_pos"))
def _forward_jit(embedding_weights, priors, targets, *, threshold, max_pos):
    B, P, E = embedding_weights.shape
    prior_feat = precompute_prior_features(priors)                  # (1, 8, Pp)
    conf_full = pallas_match(targets, prior_feat, threshold=threshold)
    conf_t = conf_full[:, :P]                                       # (B, P)
    bin_conf_t = (conf_t > 0).astype(jnp.int32)

    # Fixed-capacity on-device compaction of positive priors (jit-friendly).
    pos_flat = conf_t.reshape(-1) > 0
    count = jnp.sum(pos_flat.astype(jnp.int32))
    idx = jnp.nonzero(pos_flat, size=max_pos, fill_value=0)[0]
    emb_flat = embedding_weights.reshape(-1, E)
    emb_pos_padded = jnp.take(emb_flat, idx, axis=0)                # (max_pos, E)
    tgt_padded = jnp.take(conf_t.reshape(-1), idx)                  # (max_pos,)
    return emb_pos_padded, tgt_padded, count, conf_t, bin_conf_t


def search_imprinted_weights_forward(embedding_weights, predictions, priors,
                                     targets, *, num_classes=5,
                                     overlap_thresh=0.5, max_pos=None):
    """Mirrors search_imprinted_weights.forward -> (emb_pos, targets_belongs)."""
    del predictions, num_classes  # only shapes are used by the torch module
    B, P, _ = embedding_weights.shape
    if max_pos is None:
        max_pos = B * P  # worst-case capacity; tune down for production
    emb_pad, tgt_pad, count, conf_t, bin_conf_t = _forward_jit(
        embedding_weights, priors, targets,
        threshold=float(overlap_thresh), max_pos=int(max_pos))
    # Single scalar device->host sync to return exact-length outputs
    # (torch semantics). Jitted callers can consume (emb_pad, tgt_pad, count).
    n = int(count)
    return emb_pad[:n], tgt_pad[:n], conf_t, bin_conf_t


# -----------------------------------------------------------------------------
# Pure-numpy reference of the torch `match` semantics (verification)
# -----------------------------------------------------------------------------
def _match_ref_np(threshold, truths, priors, labels):
    p_pt = np.concatenate([priors[:, :2] - priors[:, 2:] / 2.0,
                           priors[:, :2] + priors[:, 2:] / 2.0], axis=1)
    ixmin = np.maximum(truths[:, None, 0], p_pt[None, :, 0])
    iymin = np.maximum(truths[:, None, 1], p_pt[None, :, 1])
    ixmax = np.minimum(truths[:, None, 2], p_pt[None, :, 2])
    iymax = np.minimum(truths[:, None, 3], p_pt[None, :, 3])
    inter = np.maximum(ixmax - ixmin, 0) * np.maximum(iymax - iymin, 0)
    area_t = ((truths[:, 2] - truths[:, 0]) *
              (truths[:, 3] - truths[:, 1]))[:, None]
    area_p = ((p_pt[:, 2] - p_pt[:, 0]) * (p_pt[:, 3] - p_pt[:, 1]))[None, :]
    overlaps = inter / (area_t + area_p - inter)

    best_prior_idx = overlaps.argmax(1)
    best_truth_overlap = overlaps.max(0).copy()
    best_truth_idx = overlaps.argmax(0).copy()
    best_truth_overlap[best_prior_idx] = 2.0
    for j in range(best_prior_idx.shape[0]):
        best_truth_idx[best_prior_idx[j]] = j
    conf = labels[best_truth_idx] + 1
    conf[best_truth_overlap < threshold] = 0
    conf = conf.astype(np.int32)
    return conf, (conf > 0).astype(np.int32)


if __name__ == "__main__":
    key = jax.random.PRNGKey(0)
    B, O, P, E = 2, 8, 256, 32
    NUM_CLASSES = 5
    THRESH = 0.5

    k = jax.random.split(key, 8)
    # Ground-truth boxes in point form (xmin, ymin, xmax, ymax) in [0, 1].
    xy1 = jax.random.uniform(k[0], (B, O, 2), minval=0.0, maxval=0.7)
    wh = jax.random.uniform(k[1], (B, O, 2), minval=0.05, maxval=0.3)
    boxes = jnp.concatenate([xy1, jnp.minimum(xy1 + wh, 1.0)], axis=-1)
    labels = jax.random.randint(k[2], (B, O, 1), 0, NUM_CLASSES - 1).astype(
        jnp.float32)
    targets = jnp.concatenate([boxes, labels], axis=-1)           # (B, O, 5)

    # Priors in center-size form.
    p_cxy = jax.random.uniform(k[3], (P, 2), minval=0.05, maxval=0.95)
    p_wh = jax.random.uniform(k[4], (P, 2), minval=0.05, maxval=0.3)
    priors = jnp.concatenate([p_cxy, p_wh], axis=-1)              # (P, 4)

    embedding_weights = jax.random.normal(k[5], (B, P, E), jnp.float32)
    predictions = (
        jax.random.normal(k[6], (B, P, 4), jnp.float32),
        jax.random.normal(k[7], (B, P, NUM_CLASSES), jnp.float32),
        jnp.zeros((B, P, 2), jnp.float32),
    )

    emb_pos, tgt_belongs, conf_t, bin_conf_t = search_imprinted_weights_forward(
        embedding_weights, predictions, priors, targets,
        num_classes=NUM_CLASSES, overlap_thresh=THRESH)
    jax.block_until_ready((emb_pos, tgt_belongs, conf_t, bin_conf_t))

    # Verify against a numpy reference of the torch matching logic.
    conf_np = np.asarray(conf_t)
    bin_np = np.asarray(bin_conf_t)
    for b in range(B):
        ref_conf, ref_bin = _match_ref_np(
            THRESH, np.asarray(boxes[b]), np.asarray(priors),
            np.asarray(labels[b, :, 0]))
        assert np.array_equal(conf_np[b], ref_conf), "conf_t mismatch"
        assert np.array_equal(bin_np[b], ref_bin), "bin_conf_t mismatch"

    # Verify the positive compaction matches torch boolean-mask semantics.
    pos_np = conf_np.reshape(-1) > 0
    emb_ref = np.asarray(embedding_weights).reshape(-1, E)[pos_np]
    tgt_ref = conf_np.reshape(-1)[pos_np]
    assert emb_pos.shape == emb_ref.shape and emb_pos.shape[0] > 0
    assert np.array_equal(np.asarray(emb_pos), emb_ref), "emb_pos mismatch"
    assert np.array_equal(np.asarray(tgt_belongs), tgt_ref), "targets mismatch"
    assert bool(jnp.all(tgt_belongs > 0))
    print("KERNEL_OK")
</pallas_src>

<mosaic_0001>
module attributes {stable_mosaic.version = 11 : i64} {
  func.func @_match_kernel(%arg0: i32, %arg1: memref<2x8x5xf32, #tpu.memory_space<vmem>>, %arg2: memref<1x8x256xf32, #tpu.memory_space<vmem>>, %arg3: memref<2x1x256xi32, #tpu.memory_space<vmem>>) attributes {dimension_semantics = [#tpu.dimension_semantics<parallel>], iteration_bounds = array<i64: 1>, scalar_prefetch = 0 : i64, scratch_operands = 0 : i64, tpu.core_type = #tpu.core_type<tc>, window_params = [{transform_indices = @transform_0, window_bounds = array<i64: 2, 8, 5>}, {pipeline_mode = #tpu.pipeline_mode<synchronous>, transform_indices = @transform_1, window_bounds = array<i64: 1, 8, 256>}, {transform_indices = @transform_2, window_bounds = array<i64: 2, 1, 256>}]} {
    %c0 = arith.constant 0 : index
    %c0_0 = arith.constant 0 : index
    %c0_1 = arith.constant 0 : index
    %0 = vector.load %arg1[%c0, %c0_0, %c0_1] : memref<2x8x5xf32, #tpu.memory_space<vmem>>, vector<2x8x5xf32>
    %1 = vector.extract_strided_slice %0 {offsets = [0, 0, 0], sizes = [2, 8, 1], strides = [1, 1, 1]} : vector<2x8x5xf32> to vector<2x8x1xf32>
    %2 = vector.extract_strided_slice %0 {offsets = [0, 0, 1], sizes = [2, 8, 1], strides = [1, 1, 1]} : vector<2x8x5xf32> to vector<2x8x1xf32>
    %3 = vector.extract_strided_slice %0 {offsets = [0, 0, 2], sizes = [2, 8, 1], strides = [1, 1, 1]} : vector<2x8x5xf32> to vector<2x8x1xf32>
    %4 = vector.extract_strided_slice %0 {offsets = [0, 0, 3], sizes = [2, 8, 1], strides = [1, 1, 1]} : vector<2x8x5xf32> to vector<2x8x1xf32>
    %5 = vector.extract_strided_slice %0 {offsets = [0, 0, 4], sizes = [2, 8, 1], strides = [1, 1, 1]} : vector<2x8x5xf32> to vector<2x8x1xf32>
    %6 = arith.fptosi %5 : vector<2x8x1xf32> to vector<2x8x1xi32>
    %c0_2 = arith.constant 0 : index
    %c0_3 = arith.constant 0 : index
    %c0_4 = arith.constant 0 : index
    %7 = vector.load %arg2[%c0_2, %c0_3, %c0_4] : memref<1x8x256xf32, #tpu.memory_space<vmem>>, vector<1x8x256xf32>
    %8 = vector.extract_strided_slice %7 {offsets = [0, 0, 0], sizes = [1, 1, 256], strides = [1, 1, 1]} : vector<1x8x256xf32> to vector<1x1x256xf32>
    %9 = vector.extract_strided_slice %7 {offsets = [0, 1, 0], sizes = [1, 1, 256], strides = [1, 1, 1]} : vector<1x8x256xf32> to vector<1x1x256xf32>
    %10 = vector.extract_strided_slice %7 {offsets = [0, 2, 0], sizes = [1, 1, 256], strides = [1, 1, 1]} : vector<1x8x256xf32> to vector<1x1x256xf32>
    %11 = vector.extract_strided_slice %7 {offsets = [0, 3, 0], sizes = [1, 1, 256], strides = [1, 1, 1]} : vector<1x8x256xf32> to vector<1x1x256xf32>
    %12 = vector.extract_strided_slice %7 {offsets = [0, 4, 0], sizes = [1, 1, 256], strides = [1, 1, 1]} : vector<1x8x256xf32> to vector<1x1x256xf32>
    %13 = vector.broadcast %3 : vector<2x8x1xf32> to vector<2x8x256xf32>
    %14 = vector.broadcast %10 : vector<1x1x256xf32> to vector<2x8x256xf32>
    %15 = arith.minimumf %13, %14 : vector<2x8x256xf32>
    %16 = vector.broadcast %1 : vector<2x8x1xf32> to vector<2x8x256xf32>
    %17 = vector.broadcast %8 : vector<1x1x256xf32> to vector<2x8x256xf32>
    %18 = arith.maximumf %16, %17 : vector<2x8x256xf32>
    %19 = arith.subf %15, %18 : vector<2x8x256xf32>
    %cst = arith.constant 0.000000e+00 : f32
    %20 = vector.broadcast %cst : f32 to vector<2x8x256xf32>
    %21 = arith.maximumf %19, %20 : vector<2x8x256xf32>
    %22 = vector.broadcast %4 : vector<2x8x1xf32> to vector<2x8x256xf32>
    %23 = vector.broadcast %11 : vector<1x1x256xf32> to vector<2x8x256xf32>
    %24 = arith.minimumf %22, %23 : vector<2x8x256xf32>
    %25 = vector.broadcast %2 : vector<2x8x1xf32> to vector<2x8x256xf32>
    %26 = vector.broadcast %9 : vector<1x1x256xf32> to vector<2x8x256xf32>
    %27 = arith.maximumf %25, %26 : vector<2x8x256xf32>
    %28 = arith.subf %24, %27 : vector<2x8x256xf32>
    %cst_5 = arith.constant 0.000000e+00 : f32
    %29 = vector.broadcast %cst_5 : f32 to vector<2x8x256xf32>
    %30 = arith.maximumf %28, %29 : vector<2x8x256xf32>
    %31 = arith.mulf %21, %30 : vector<2x8x256xf32>
    %32 = arith.subf %3, %1 : vector<2x8x1xf32>
    %33 = arith.subf %4, %2 : vector<2x8x1xf32>
    %34 = arith.mulf %32, %33 : vector<2x8x1xf32>
    %35 = vector.broadcast %34 : vector<2x8x1xf32> to vector<2x8x256xf32>
    %36 = vector.broadcast %12 : vector<1x1x256xf32> to vector<2x8x256xf32>
    %37 = arith.addf %35, %36 : vector<2x8x256xf32>
    %38 = arith.subf %37, %31 : vector<2x8x256xf32>
    %39 = arith.divf %31, %38 : vector<2x8x256xf32>
    %40 = tpu.iota {dimensions = array<i32: 1>} : vector<1x8x1xi32>
    %41 = tpu.iota {dimensions = array<i32: 2>} : vector<1x1x256xi32>
    %cst_6 = arith.constant dense<0xFF800000> : vector<2x256xf32>
    %42 = vector.multi_reduction <maximumf>, %39, %cst_6 [1] : vector<2x8x256xf32> to vector<2x256xf32>
    %43 = vector.shape_cast %42 : vector<2x256xf32> to vector<2x1x256xf32>
    %44 = vector.broadcast %43 : vector<2x1x256xf32> to vector<2x8x256xf32>
    %45 = arith.cmpf oge, %39, %44 : vector<2x8x256xf32>
    %c1073741824_i32 = arith.constant 1073741824 : i32
    %46 = vector.shape_cast %40 : vector<1x8x1xi32> to vector<1x8x1xi32>
    %47 = vector.broadcast %46 : vector<1x8x1xi32> to vector<2x8x256xi32>
    %48 = vector.broadcast %c1073741824_i32 : i32 to vector<2x8x256xi32>
    %49 = arith.select %45, %47, %48 : vector<2x8x256xi1>, vector<2x8x256xi32>
    %cst_7 = arith.constant dense<2147483647> : vector<2x256xi32>
    %50 = vector.multi_reduction <minsi>, %49, %cst_7 [1] : vector<2x8x256xi32> to vector<2x256xi32>
    %51 = vector.shape_cast %50 : vector<2x256xi32> to vector<2x1x256xi32>
    %cst_8 = arith.constant dense<0xFF800000> : vector<2x8xf32>
    %52 = vector.multi_reduction <maximumf>, %39, %cst_8 [2] : vector<2x8x256xf32> to vector<2x8xf32>
    %53 = vector.shape_cast %52 : vector<2x8xf32> to vector<2x8x1xf32>
    %54 = vector.broadcast %53 : vector<2x8x1xf32> to vector<2x8x256xf32>
    %55 = arith.cmpf oge, %39, %54 : vector<2x8x256xf32>
    %c1073741824_i32_9 = arith.constant 1073741824 : i32
    %56 = vector.shape_cast %41 : vector<1x1x256xi32> to vector<1x1x256xi32>
    %57 = vector.broadcast %56 : vector<1x1x256xi32> to vector<2x8x256xi32>
    %58 = vector.broadcast %c1073741824_i32_9 : i32 to vector<2x8x256xi32>
    %59 = arith.select %55, %57, %58 : vector<2x8x256xi1>, vector<2x8x256xi32>
    %cst_10 = arith.constant dense<2147483647> : vector<2x8xi32>
    %60 = vector.multi_reduction <minsi>, %59, %cst_10 [2] : vector<2x8x256xi32> to vector<2x8xi32>
    %61 = vector.shape_cast %60 : vector<2x8xi32> to vector<2x8x1xi32>
    %62 = vector.broadcast %41 : vector<1x1x256xi32> to vector<2x8x256xi32>
    %63 = vector.broadcast %61 : vector<2x8x1xi32> to vector<2x8x256xi32>
    %64 = arith.cmpi eq, %62, %63 : vector<2x8x256xi32>
    %c-1_i32 = arith.constant -1 : i32
    %65 = vector.shape_cast %40 : vector<1x8x1xi32> to vector<1x8x1xi32>
    %66 = vector.broadcast %65 : vector<1x8x1xi32> to vector<2x8x256xi32>
    %67 = vector.broadcast %c-1_i32 : i32 to vector<2x8x256xi32>
    %68 = arith.select %64, %66, %67 : vector<2x8x256xi1>, vector<2x8x256xi32>
    %cst_11 = arith.constant dense<-2147483648> : vector<2x256xi32>
    %69 = vector.multi_reduction <maxsi>, %68, %cst_11 [1] : vector<2x8x256xi32> to vector<2x256xi32>
    %70 = vector.shape_cast %69 : vector<2x256xi32> to vector<2x1x256xi32>
    %c0_i32 = arith.constant 0 : i32
    %71 = vector.broadcast %c0_i32 : i32 to vector<2x1x256xi32>
    %72 = arith.cmpi sge, %70, %71 : vector<2x1x256xi32>
    %cst_12 = arith.constant 2.000000e+00 : f32
    %73 = vector.broadcast %cst_12 : f32 to vector<2x1x256xf32>
    %74 = arith.select %72, %73, %43 : vector<2x1x256xi1>, vector<2x1x256xf32>
    %75 = arith.select %72, %70, %51 : vector<2x1x256xi1>, vector<2x1x256xi32>
    %76 = vector.broadcast %75 : vector<2x1x256xi32> to vector<2x8x256xi32>
    %77 = vector.broadcast %40 : vector<1x8x1xi32> to vector<2x8x256xi32>
    %78 = arith.cmpi eq, %76, %77 : vector<2x8x256xi32>
    %c1_i32 = arith.constant 1 : i32
    %79 = vector.broadcast %c1_i32 : i32 to vector<2x8x1xi32>
    %80 = arith.addi %6, %79 : vector<2x8x1xi32>
    %c0_i32_13 = arith.constant 0 : i32
    %81 = vector.shape_cast %80 : vector<2x8x1xi32> to vector<2x8x1xi32>
    %82 = vector.broadcast %81 : vector<2x8x1xi32> to vector<2x8x256xi32>
    %83 = vector.broadcast %c0_i32_13 : i32 to vector<2x8x256xi32>
    %84 = arith.select %78, %82, %83 : vector<2x8x256xi1>, vector<2x8x256xi32>
    %cst_14 = arith.constant dense<0> : vector<2x256xi32>
    %85 = vector.multi_reduction <add>, %84, %cst_14 [1] : vector<2x8x256xi32> to vector<2x256xi32>
    %86 = vector.shape_cast %85 : vector<2x256xi32> to vector<2x1x256xi32>
    %cst_15 = arith.constant 5.000000e-01 : f32
    %87 = vector.broadcast %cst_15 : f32 to vector<2x1x256xf32>
    %88 = arith.cmpf olt, %74, %87 : vector<2x1x256xf32>
    %c0_i32_16 = arith.constant 0 : i32
    %89 = vector.broadcast %c0_i32_16 : i32 to vector<2x1x256xi32>
    %90 = arith.select %88, %89, %86 : vector<2x1x256xi1>, vector<2x1x256xi32>
    %c0_17 = arith.constant 0 : index
    %c0_18 = arith.constant 0 : index
    %c0_19 = arith.constant 0 : index
    %91 = vector.load %arg3[%c0_17, %c0_18, %c0_19] : memref<2x1x256xi32, #tpu.memory_space<vmem>>, vector<2x1x256xi32>
    tpu.vector_store %arg3[%c0_17, %c0_18, %c0_19], %90 {strides = array<i32>} : memref<2x1x256xi32, #tpu.memory_space<vmem>>, vector<2x1x256xi32>,
    return
  }
  func.func @transform_0(%arg0: i32) -> (i32, i32, i32) {
    %c0_i32 = arith.constant 0 : i32
    %c0_i32_0 = arith.constant 0 : i32
    %c0_i32_1 = arith.constant 0 : i32
    return %arg0, %c0_i32, %c0_i32_0 : i32, i32, i32
  }
  func.func @transform_1(%arg0: i32) -> (i32, i32, i32) {
    %c0_i32 = arith.constant 0 : i32
    %c0_i32_0 = arith.constant 0 : i32
    %c0_i32_1 = arith.constant 0 : i32
    %c0_i32_2 = arith.constant 0 : i32
    return %c0_i32, %c0_i32_0, %c0_i32_1 : i32, i32, i32
  }
  func.func @transform_2(%arg0: i32) -> (i32, i32, i32) {
    %c0_i32 = arith.constant 0 : i32
    %c0_i32_0 = arith.constant 0 : i32
    %c0_i32_1 = arith.constant 0 : i32
    return %arg0, %c0_i32, %c0_i32_0 : i32, i32, i32
  }
}

</mosaic_0001>

<bundles_post_ra>
// kernel: _forward_jit.1
= control target key start
LH: loop header
LB: loop body
LE: loop exit
PB: predicated region body
PF: predicated region fallthrough
CT: control target
= control target key end

     0   :  { %s467_s11 = smov 2   ;;  %v468_v2 = vmov 0   ;;  %v469_v3 = vmov 2   ;;  %v470_v4 = vmov 1   ;;  %v472_v7 = vmov 3   ;;  %s639_s0 = inlined_call_operand.vmem [shape: f32[2,8,5], index: 0, kind: input, shape index: {}]   ;;  %s640_s1 = inlined_call_operand.vmem [shape: f32[1,8,256], index: 1, kind: input, shape index: {}]   ;;  %s641_s2 = inlined_call_operand.vmem [shape: s32[2,1,256], index: 2, kind: output, shape index: {}]  }
   0x1   :  { %v492_v0 = vld [vmem:[%s639_s0] sm:$0xff]  ;;  %v498_v1 = vld [vmem:[%s639_s0 + $0x8] sm:$0xff]  ;;  %450 = vset.pattern.permute.xlu1 %v468_v2  ;;  %449 = vset.pattern.permute.xlu0 %v468_v2  ;;  %s471_s0 = smov 127  }
   0x2   :  { %95 = vrot.lane.b32.xlu0 %v492_v0, %s467_s11  ;;  %448 = vset.pattern.permute.xlu2 %v469_v3  ;;  %v514_v18 = vld [vmem:[%s640_s1] sm:$0xff]  ;;  %v519_v19 = vld [vmem:[%s640_s1 + $0x8] sm:$0xff] }
   0x3   :  { %19 = vperm.xlu2 %448, %v492_v0   ;;  %v27_v21 = vperm.slane %v514_v18, 2  ;;  %v28_v22 = vperm.slane %v519_v19, 2  ;;  %v77_v23 = vperm.slane %v514_v18, 1  ;;  %v78_v24 = vperm.slane %v519_v19, 1 }
   0x4   :  { %v63_v25 = vperm.slane %v514_v18, 3  ;;  %v64_v26 = vperm.slane %v519_v19, 3  ;;  %v41_v27 = vperm.slane %v514_v18, 0  ;;  %v42_v28 = vperm.slane %v519_v19, 0 }
   0x5   :  { %v123_v44 = vperm.slane %v514_v18, 4  ;;  %v124_v45 = vperm.slane %v519_v19, 4 }
   0xa   :  { %97 = vrot.lane.b32.xlu0 %v498_v1, %s467_s11 }
   0xb   :  { %24 = vperm.xlu2 %448, %v498_v1  }
  0x12   :  { %34 = vperm.xlu0 %449, %v492_v0  }
  0x13   :  { %451 = vset.pattern.permute.xlu2 %v472_v7 }
  0x14   :  { %56 = vperm.xlu2 %451, %v492_v0  }
  0x1a   :  { %454 = vset.pattern.permute.xlu0 %v470_v4 }
  0x1b   :  { %74 = vperm.xlu0 %454, %v498_v1  }
  0x1c   :  { %453 = vset.pattern.permute.xlu2 %v470_v4 }
  0x1d   :  { %70 = vperm.xlu2 %453, %v492_v0  }
  0x25   :  { %456 = vset.pattern.permute.xlu2 %v469_v3 }
  0x5d   :  { %v20_v14 = vpop.permute.xlu2 %19 }
  0x5e   :  { %v29_v50 = vmin.f32 %v20_v14, %v27_v21  ;;  %v30_v51 = vmin.f32 %v20_v14, %v28_v22 }
  0x65   :  { %v25_v15 = vpop.permute.xlu2 %24 }
  0x66   :  { %v31_v31 = vmin.f32 %v25_v15, %v27_v21  ;;  %v32_v32 = vmin.f32 %v25_v15, %v28_v22 }
  0x6e   :  { %v57_v20 = vpop.permute.xlu2 %56 }
  0x6f   :  { %v65_v57 = vmin.f32 %v57_v20, %v63_v25  ;;  %v66_v61 = vmin.f32 %v57_v20, %v64_v26 }
  0x74   :  { %v96_v5 = vpop.permute.xlu0 %95 }
  0x75   :  { %v101_v6 = vsub.f32 %v492_v0, %v96_v5 }
  0x77   :  { %105 = vrot.lane.b32.xlu1 %v101_v6, %s471_s0  ;;  %v71_v39 = vpop.permute.xlu2 %70 }
  0x78   :  { %v79_v60 = vmax.f32 %v71_v39, %v77_v23  ;;  %v80_v62 = vmax.f32 %v71_v39, %v78_v24 }
  0x7a   :  { %v83_v4 = vsub.f32 %v65_v57, %v79_v60 }
  0x7c   :  { %v98_v8 = vpop.permute.xlu0 %97 }
  0x7d   :  { %v102_v9 = vsub.f32 %v498_v1, %v98_v8  ;;  %v87_v8 = vmax.f32 %v83_v4, 0.0 }
  0x7f   :  { %107 = vrot.lane.b32.xlu1 %v102_v9, %s471_s0 }
  0x84   :  { %v35_v16 = vpop.permute.xlu0 %34 }
  0x85   :  { %v43_v58 = vmax.f32 %v35_v16, %v41_v27  ;;  %v44_v59 = vmax.f32 %v35_v16, %v42_v28 }
  0x87   :  { %38 = vperm.xlu1 %450, %v498_v1   ;;  %v48_v5 = vsub.f32 %v30_v51, %v44_v59 }
  0x8d   :  { %v75_v29 = vpop.permute.xlu0 %74 }
  0x8e   :  { %v81_v33 = vmax.f32 %v75_v29, %v77_v23  ;;  %v82_v34 = vmax.f32 %v75_v29, %v78_v24 }
  0x8f   :  { %452 = vset.pattern.permute.xlu1 %v472_v7 }
  0x90   :  { %60 = vperm.xlu1 %452, %v498_v1  }
  0x98   :  { %455 = vset.pattern.permute.xlu1 %v469_v3  ;;  %v47_v3 = vsub.f32 %v29_v50, %v43_v58 }
  0x9a   :  { %v51_v7 = vmax.f32 %v47_v3, 0.0 }
  0x9c   :  { %v91_v16 = vmul.f32 %v87_v8, %v51_v7 }
  0xe9   :  { %v106_v10 = vpop.permute.xlu1 %105 }
  0xea   :  { %v111_v11 = vmul.f32 %v106_v10, %v101_v6  ;;  %v84_v6 = vsub.f32 %v66_v61, %v80_v62  ;;  %v52_v10 = vmax.f32 %v48_v5, 0.0 }
  0xec   :  { %115 = vperm.xlu1 %455, %v111_v11   ;;  %v88_v11 = vmax.f32 %v84_v6, 0.0 }
  0xee   :  { %v92_v20 = vmul.f32 %v88_v11, %v52_v10 }
  0xf1   :  { %v108_v12 = vpop.permute.xlu1 %107 }
  0xf2   :  { %v112_v13 = vmul.f32 %v108_v12, %v102_v9 }
  0xf4   :  { %120 = vperm.xlu2 %456, %v112_v13  }
  0xf9   :  { %v39_v17 = vpop.permute.xlu1 %38 }
  0xfa   :  { %v45_v35 = vmax.f32 %v39_v17, %v41_v27  ;;  %v46_v36 = vmax.f32 %v39_v17, %v42_v28 }
  0xfc   :  { %v49_v40 = vsub.f32 %v31_v31, %v45_v35  ;;  %v50_v41 = vsub.f32 %v32_v32, %v46_v36 }
  0xfe   :  { %v53_v46 = vmax.f32 %v49_v40, 0.0  ;;  %v54_v47 = vmax.f32 %v50_v41, 0.0 }
 0x102   :  { %v61_v30 = vpop.permute.xlu1 %60 }
 0x103   :  { %v67_v37 = vmin.f32 %v61_v30, %v63_v25  ;;  %v68_v38 = vmin.f32 %v61_v30, %v64_v26 }
 0x105   :  { %v85_v42 = vsub.f32 %v67_v37, %v81_v33  ;;  %v86_v43 = vsub.f32 %v68_v38, %v82_v34 }
 0x107   :  { %v89_v48 = vmax.f32 %v85_v42, 0.0  ;;  %v90_v49 = vmax.f32 %v86_v43, 0.0 }
 0x109   :  { %v93_v53 = vmul.f32 %v89_v48, %v53_v46  ;;  %v94_v54 = vmul.f32 %v90_v49, %v54_v47 }
 0x14e   :  { %v121_v52 = vpop.permute.xlu2 %120 }
 0x14f   :  { %v127_v55 = vadd.f32 %v123_v44, %v121_v52  ;;  %v128_v56 = vadd.f32 %v124_v45, %v121_v52 }
 0x151   :  { %v131_v63 = vsub.f32 %v127_v55, %v93_v53  ;;  %v132_v2 = vsub.f32 %v128_v56, %v94_v54 }
 0x153   :  { %459 = vrcp.f32 %v131_v63  ;;  %v172_v17 = vand.u32 2147483647, %v131_v63  ;;  %v174_v18 = vand.u32 2147483648, %v131_v63  ;;  %v187_v22 = vand.u32 2147483647, %v132_v2 }
 0x154   :  { %461 = vrcp.f32 %v132_v2  ;;  %v189_v23 = vand.u32 2147483648, %v132_v2  ;;  %vm168_vm2 = vweird.f32 %v131_v63  ;;  %vm183_vm3 = vweird.f32 %v132_v2 }
 0x155   :  { %v175_v29 = vor.u32 1.1754944e-38, %v174_v18  ;;  %vm173_vm5 = vcmp.eq.f32.partialorder %v172_v17, 8.507059e+37  ;;  %vm188_vm7 = vcmp.eq.f32.partialorder %v187_v22, 8.507059e+37  ;;  %v432_v17 = vceil.f32 %v492_v0 }
 0x156   :  { %v190_v34 = vor.u32 1.1754944e-38, %v189_v23  ;;  %v433_v18 = vfloor.f32 %v492_v0 }
 0x159   :  { %v460_v9 = vpop.eup %459 }
 0x15a   :  { %v462_v12 = vpop.eup %461  ;;  %v164_v13 = vmul.f32 %v460_v9, %v131_v63  ;;  %vm169_vm0 = vweird.f32 %v460_v9 }
 0x15b   :  { %v179_v14 = vmul.f32 %v462_v12, %v132_v2  ;;  %vm184_vm1 = vweird.f32 %v462_v12  ;;  %vm170_vm4 = vmor %vm168_vm2, %vm169_vm0  ;;  %v193_v2 = vlaneseq }
 0x15c   :  { %v165_v15 = vsub.f32 1.0, %v164_v13  ;;  %vm185_vm6 = vmor %vm183_vm3, %vm184_vm1 }
 0x15d   :  { %v180_v19 = vsub.f32 1.0, %v179_v14  ;;  %v544_v3 = vand.u32 127, %v193_v2 }
 0x15e   :  { %v166_v21 = vmul.f32 %v460_v9, %v165_v15  ;;  %v116_v24 = vpop.permute.xlu1 %115 }
 0x15f   :  { %v181_v25 = vmul.f32 %v462_v12, %v180_v19  ;;  %v125_v26 = vadd.f32 %v123_v44, %v116_v24  ;;  %v126_v27 = vadd.f32 %v124_v45, %v116_v24  ;;  %v547_v4 = vadd.s32 128, %v544_v3 }
 0x160   :  { %v167_v28 = vadd.f32 %v460_v9, %v166_v21  ;;  %v473_v19 = vmov 4  }
 0x161   :  { %v182_v30 = vadd.f32 %v462_v12, %v181_v25  ;;  %v129_v31 = vsub.f32 %v125_v26, %v91_v16  ;;  %v130_v32 = vsub.f32 %v126_v27, %v92_v20  ;;  %457 = vset.pattern.permute.xlu0 %v473_v19  ;;  %458 = vset.pattern.permute.xlu1 %v473_v19 }
 0x162   :  { %v171_v33 = vsel %vm170_vm4, %v460_v9, %v167_v28 }
 0x163   :  { %v176_v35 = vsel %vm173_vm5, %v175_v29, %v171_v33  ;;  %v186_v36 = vsel %vm185_vm6, %v462_v12, %v182_v30  ;;  %463 = vrcp.f32 %v129_v31  ;;  %v144_v46 = vand.u32 2147483648, %v129_v31 }
 0x164   :  { %v531_v37 = vmul.f32 %v176_v35, %v93_v53  ;;  %v191_v38 = vsel %vm188_vm7, %v190_v34, %v186_v36  ;;  %465 = vrcp.f32 %v130_v32  ;;  %v142_v48 = vand.u32 2147483647, %v129_v31 }
 0x165   :  { %v533_v39 = vmul.f32 %v191_v38, %v94_v54  ;;  %vm138_vm9 = vweird.f32 %v129_v31  ;;  %v159_v50 = vand.u32 2147483648, %v130_v32  ;;  %v157_v53 = vand.u32 2147483647, %v130_v32 }
 0x166   :  { %v145_v54 = vor.u32 1.1754944e-38, %v144_v46  ;;  %vm143_vm12 = vcmp.eq.f32.partialorder %v142_v48, 8.507059e+37  ;;  %vm153_vm13 = vweird.f32 %v130_v32  ;;  %vm431_vm6 = vcmp.lt.s32.totalorder %v492_v0, 0 }
 0x167   :  { %v269_v40 = vmax.f32 %v531_v37, %v533_v39  ;;  %v160_v58 = vor.u32 1.1754944e-38, %v159_v50  ;;  %vm158_vm15 = vcmp.eq.f32.partialorder %v157_v53, 8.507059e+37  ;;  %v437_v30 = vceil.f32 %v498_v1 }
 0x168   :  { %v210_v38 = vrot.slane %v531_v37, 4 }
 0x169   :  { %v464_v41 = vpop.eup %463  ;;  %270 = vmax.xlane.f32.xlu2 %v269_v40  ;;  %v216_v40 = vrot.slane %v533_v39, 4 }
 0x16a   :  { %v134_v42 = vmul.f32 %v464_v41, %v129_v31  ;;  %v466_v43 = vpop.eup %465  ;;  %vm139_vm8 = vweird.f32 %v464_v41  ;;  %v438_v31 = vfloor.f32 %v498_v1 }
 0x16b   :  { %v149_v45 = vmul.f32 %v466_v43, %v130_v32  ;;  %vm154_vm10 = vweird.f32 %v466_v43  ;;  %vm140_vm11 = vmor %vm138_vm9, %vm139_vm8  ;;  %vm436_vm9 = vcmp.lt.s32.totalorder %v498_v1, 0  ;;  %v217_v1 = vmax.f32 %v533_v39, %v216_v40 }
 0x16c   :  { %v135_v44 = vsub.f32 1.0, %v134_v42  ;;  %vm155_vm14 = vmor %vm153_vm13, %vm154_vm10  ;;  %v439_v32 = vsel %vm436_vm9, %v437_v30, %v438_v31 }
 0x16d   :  { %v150_v49 = vsub.f32 1.0, %v149_v45  ;;  %v440_v33 = vcvt.f32.s32 %v439_v32 }
 0x16e   :  { %v136_v47 = vmul.f32 %v464_v41, %v135_v44 }
 0x16f   :  { %v151_v52 = vmul.f32 %v466_v43, %v150_v49  ;;  %v373_v34 = vadd.s32 1, %v440_v33 }
 0x170   :  { %v137_v51 = vadd.f32 %v464_v41, %v136_v47  ;;  %v218_v47 = vrot.slane %v217_v1, 2 }
 0x171   :  { %v152_v56 = vadd.f32 %v466_v43, %v151_v52 }
 0x172   :  { %v141_v55 = vsel %vm140_vm11, %v464_v41, %v137_v51  ;;  %v219_v51 = vmax.f32 %v217_v1, %v218_v47 }
 0x173   :  { %v146_v57 = vsel %vm143_vm12, %v145_v54, %v141_v55  ;;  %v156_v60 = vsel %vm155_vm14, %v466_v43, %v152_v56  ;;  %v211_v43 = vmax.f32 %v531_v37, %v210_v38 }
 0x174   :  { %v537_v59 = vmul.f32 %v146_v57, %v91_v16  ;;  %v161_v61 = vsel %vm158_vm15, %v160_v58, %v156_v60  ;;  %v220_v55 = vrot.slane %v219_v51, 1 }
 0x175   :  { %v539_v62 = vmul.f32 %v161_v61, %v92_v20  ;;  %v434_v20 = vsel %vm431_vm6, %v432_v17, %v433_v18  ;;  %v212_v46 = vrot.slane %v211_v43, 2 }
 0x176   :  { %v435_v21 = vcvt.f32.s32 %v434_v20  ;;  %v198_v35 = vrot.slane %v537_v59, 4 }
 0x177   :  { %v266_v63 = vmax.f32 %v537_v59, %v539_v62  ;;  %v204_v36 = vrot.slane %v539_v62, 4  ;;  %v213_v50 = vmax.f32 %v211_v43, %v212_v46 }
 0x178   :  { %v372_v22 = vadd.s32 1, %v435_v21  ;;  %v199_v41 = vmax.f32 %v537_v59, %v198_v35 }
 0x179   :  { %267 = vmax.xlane.f32.xlu1 %v266_v63  ;;  %v205_v42 = vmax.f32 %v539_v62, %v204_v36  ;;  %v214_v54 = vrot.slane %v213_v50, 1  ;;  %v580_v63 = vmax.f32 %v219_v51, %v220_v55 }
 0x17a   :  { %v200_v44 = vrot.slane %v199_v41, 2 }
 0x17b   :  { %v206_v45 = vrot.slane %v205_v42, 2  ;;  %v578_v61 = vmax.f32 %v213_v50, %v214_v54  ;;  %vm225_vm13 = vcmp.ge.f32.partialorder %v533_v39, %v580_v63 }
 0x17c   :  { %v201_v48 = vmax.f32 %v199_v41, %v200_v44 }
 0x17d   :  { %v207_v49 = vmax.f32 %v205_v42, %v206_v45  ;;  %vm224_vm12 = vcmp.ge.f32.partialorder %v531_v37, %v578_v61 }
 0x17e   :  { %v202_v52 = vrot.slane %v201_v48, 1 }
 0x17f   :  { %v208_v53 = vrot.slane %v207_v49, 1 }
 0x180   :  { %v574_v57 = vmax.f32 %v201_v48, %v202_v52 }
 0x181   :  { %v576_v58 = vmax.f32 %v207_v49, %v208_v53 }
 0x182   :  { %vm222_vm10 = vcmp.ge.f32.partialorder %v537_v59, %v574_v57 }
 0x183   :  { %vm223_vm11 = vcmp.ge.f32.partialorder %v539_v62, %v576_v58 }
 0x1dc   :  { %v271_v5 = vpop.xlane.xlu2 %270 }
 0x1dd   :  { %vm274_vm0 = vcmp.ge.f32.partialorder %v531_v37, %v271_v5  ;;  %vm275_vm1 = vcmp.ge.f32.partialorder %v533_v39, %v271_v5 }
 0x1de   :  { %v278_v6 = vsel %vm274_vm0, %v544_v3, 1073741824  ;;  %v279_v7 = vsel %vm275_vm1, %v547_v4, 1073741824 }
 0x1df   :  { %vm296_vm2 = vcmp.lt.s32.totalorder %v278_v6, %v279_v7 }
 0x1e0   :  { %v297_v8 = vsel %vm296_vm2, %v278_v6, %v279_v7  ;;  %v583_v7 = vshrl.u32 %v193_v2, 7 }
 0x1e1   :  { %v299_v9 = vshra.s32 %v297_v8, 16  ;;  %v298_v23 = vand.u32 65535, %v297_v8 }
 0x1e2   :  { %v229_v37 = vsel %vm225_vm13, %v583_v7, 1073741824 }
 0x1e3   :  { %v301_v10 = vcvt.s32.f32 %v299_v9  ;;  %v300_v25 = vcvt.s32.f32 %v298_v23 }
 0x1e5   :  { %302 = vmin.xlane.f32.xlu2 %v301_v10 }
 0x1ec   :  { %v268_v11 = vpop.xlane.xlu1 %267 }
 0x1ed   :  { %vm272_vm3 = vcmp.ge.f32.partialorder %v537_v59, %v268_v11  ;;  %vm273_vm4 = vcmp.ge.f32.partialorder %v539_v62, %v268_v11  ;;  %v226_v11 = vsel %vm222_vm10, %v583_v7, 1073741824  ;;  %v227_v59 = vsel %vm223_vm11, %v583_v7, 1073741824 }
 0x1ee   :  { %v276_v12 = vsel %vm272_vm3, %v544_v3, 1073741824  ;;  %v277_v13 = vsel %vm273_vm4, %v547_v4, 1073741824  ;;  %v230_v39 = vrot.slane %v226_v11, 4 }
 0x1ef   :  { %vm280_vm5 = vcmp.lt.s32.totalorder %v276_v12, %v277_v13 }
 0x1f0   :  { %v281_v14 = vsel %vm280_vm5, %v276_v12, %v277_v13  ;;  %v228_v13 = vsel %vm224_vm12, %v583_v7, 1073741824  ;;  %vm231_vm2 = vcmp.lt.s32.totalorder %v226_v11, %v230_v39 }
 0x1f1   :  { %v283_v15 = vshra.s32 %v281_v14, 16  ;;  %v282_v27 = vand.u32 65535, %v281_v14  ;;  %v239_v14 = vrot.slane %v227_v59, 4 }
 0x1f3   :  { %v285_v16 = vcvt.s32.f32 %v283_v15  ;;  %v284_v29 = vcvt.s32.f32 %v282_v27  ;;  %v248_v15 = vrot.slane %v228_v13, 4  ;;  %vm240_vm3 = vcmp.lt.s32.totalorder %v227_v59, %v239_v14 }
 0x1f4   :  { %v241_v23 = vsel %vm240_vm3, %v227_v59, %v239_v14 }
 0x1f5   :  { %286 = vmin.xlane.f32.xlu0 %v285_v16  ;;  %vm249_vm4 = vcmp.lt.s32.totalorder %v228_v13, %v248_v15  ;;  %v242_v30 = vrot.slane %v241_v23, 2 }
 0x1f7   :  { %vm243_vm11 = vcmp.lt.s32.totalorder %v241_v23, %v242_v30 }
 0x209   :  { %375 = vperm.xlu0 %457, %v372_v22   ;;  %v232_v22 = vsel %vm231_vm2, %v226_v11, %v230_v39 }
 0x258   :  { %v303_v24 = vpop.xlane.xlu2 %302 }
 0x259   :  { %vm304_vm7 = vcmp.eq.f32.partialorder %v301_v10, %v303_v24  ;;  %v309_v56 = vcvt.f32.s32 %v303_v24 }
 0x25a   :  { %v305_v26 = vsel %vm304_vm7, %v300_v25, inf  ;;  %v250_v25 = vsel %vm249_vm4, %v228_v13, %v248_v15 }
 0x25b   :  { %306 = vmin.xlane.f32.xlu2 %v305_v26  ;;  %v310_v5 = vshll.u32 %v309_v56, 16  ;;  %v251_v32 = vrot.slane %v250_v25, 2 }
 0x25d   :  { %vm252_vm12 = vcmp.lt.s32.totalorder %v250_v25, %v251_v32 }
 0x25e   :  { %v253_v44 = vsel %vm252_vm12, %v250_v25, %v251_v32 }
 0x25f   :  { %v254_v50 = vrot.slane %v253_v44, 1 }
 0x268   :  { %v560_v28 = vpop.xlane.xlu0 %286 }
 0x269   :  { %vm288_vm8 = vcmp.eq.f32.partialorder %v285_v16, %v560_v28  ;;  %v257_v16 = vrot.slane %v229_v37, 4  ;;  %v293_v19 = vcvt.f32.s32 %v560_v28 }
 0x26a   :  { %v289_v0 = vsel %vm288_vm8, %v284_v29, inf }
 0x26b   :  { %290 = vmin.xlane.f32.xlu1 %v289_v0  ;;  %vm258_vm5 = vcmp.lt.s32.totalorder %v229_v37, %v257_v16  ;;  %v294_v27 = vshll.u32 %v293_v19, 16  ;;  %v233_v0 = vrot.slane %v232_v22, 2 }
 0x26c   :  { %v259_v26 = vsel %vm258_vm5, %v229_v37, %v257_v16 }
 0x26d   :  { %v260_v33 = vrot.slane %v259_v26, 2  ;;  %vm234_vm10 = vcmp.lt.s32.totalorder %v232_v22, %v233_v0 }
 0x26e   :  { %v235_v43 = vsel %vm234_vm10, %v232_v22, %v233_v0 }
 0x26f   :  { %vm261_vm13 = vcmp.lt.s32.totalorder %v259_v26, %v260_v33  ;;  %v236_v48 = vrot.slane %v235_v43, 1 }
 0x270   :  { %v262_v45 = vsel %vm261_vm13, %v259_v26, %v260_v33 }
 0x271   :  { %v263_v51 = vrot.slane %v262_v45, 1  ;;  %vm237_vm4 = vcmp.lt.s32.totalorder %v235_v43, %v236_v48 }
 0x284   :  { %378 = vperm.xlu1 %458, %v373_v34  }
 0x2ce   :  { %v307_v60 = vpop.xlane.xlu2 %306 }
 0x2cf   :  { %v308_v6 = vcvt.f32.s32 %v307_v60 }
 0x2d1   :  { %v311_v8 = vadd.s32 %v310_v5, %v308_v6 }
 0x2d3   :  { %vm314_vm14 = vcmp.eq.s32.totalorder %v544_v3, %v311_v8  ;;  %vm315_vm15 = vcmp.eq.s32.totalorder %v547_v4, %v311_v8  ;;  %v238_v8 = vsel %vm237_vm4, %v235_v43, %v236_v48  ;;  %vm621_vm4 = vcmp.lt.s32.totalorder %v193_v2, 256 }
 0x2d4   :  { %v318_v9 = vsel %vm314_vm14, %v583_v7, 4294967295  ;;  %v319_v10 = vsel %vm315_vm15, %v583_v7, 4294967295 }
 0x2d5   :  { %v338_v12 = vrot.slane %v318_v9, 4  ;;  %v347_v62 = vrot.slane %v319_v10, 4 }
 0x2d7   :  { %vm339_vm0 = vcmp.gt.s32.totalorder %v318_v9, %v338_v12  ;;  %vm348_vm1 = vcmp.gt.s32.totalorder %v319_v10, %v347_v62 }
 0x2d8   :  { %v340_v17 = vsel %vm339_vm0, %v318_v9, %v338_v12  ;;  %v349_v18 = vsel %vm348_vm1, %v319_v10, %v347_v62  ;;  %v376_v10 = vpop.permute.xlu0 %375 }
 0x2d9   :  { %v341_v20 = vrot.slane %v340_v17, 2  ;;  %v350_v21 = vrot.slane %v349_v18, 2 }
 0x2db   :  { %vm342_vm6 = vcmp.gt.s32.totalorder %v340_v17, %v341_v20  ;;  %vm351_vm7 = vcmp.gt.s32.totalorder %v349_v18, %v350_v21 }
 0x2dc   :  { %v343_v28 = vsel %vm342_vm6, %v340_v17, %v341_v20  ;;  %v352_v34 = vsel %vm351_vm7, %v349_v18, %v350_v21 }
 0x2dd   :  { %v344_v41 = vrot.slane %v343_v28, 1  ;;  %v353_v42 = vrot.slane %v352_v34, 1 }
 0x2de   :  { %v291_v24 = vpop.xlane.xlu1 %290 }
 0x2df   :  { %v292_v29 = vcvt.f32.s32 %v291_v24  ;;  %vm345_vm0 = vcmp.gt.s32.totalorder %v343_v28, %v344_v41  ;;  %vm354_vm1 = vcmp.gt.s32.totalorder %v352_v34, %v353_v42 }
 0x2e0   :  { %v346_v56 = vsel %vm345_vm0, %v343_v28, %v344_v41  ;;  %v355_v60 = vsel %vm354_vm1, %v352_v34, %v353_v42 }
 0x2e1   :  { %v295_v31 = vadd.s32 %v294_v27, %v292_v29  ;;  %vm358_vm10 = vcmp.ge.s32.totalorder %v346_v56, 0 }
 0x2e3   :  { %vm312_vm8 = vcmp.eq.s32.totalorder %v544_v3, %v295_v31  ;;  %vm313_vm9 = vcmp.eq.s32.totalorder %v547_v4, %v295_v31  ;;  %v244_v3 = vsel %vm243_vm11, %v241_v23, %v242_v30  ;;  %vm359_vm11 = vcmp.ge.s32.totalorder %v355_v60, 0 }
 0x2e4   :  { %v316_v35 = vsel %vm312_vm8, %v583_v7, 4294967295  ;;  %v317_v36 = vsel %vm313_vm9, %v583_v7, 4294967295  ;;  %v245_v49 = vrot.slane %v244_v3, 1  ;;  %vm255_vm8 = vcmp.lt.s32.totalorder %v253_v44, %v254_v50 }
 0x2e5   :  { %v320_v38 = vrot.slane %v316_v35, 4  ;;  %v329_v40 = vrot.slane %v317_v36, 4  ;;  %vm264_vm9 = vcmp.lt.s32.totalorder %v262_v45, %v263_v51  ;;  %v256_v12 = vsel %vm255_vm8, %v253_v44, %v254_v50 }
 0x2e6   :  { %vm246_vm5 = vcmp.lt.s32.totalorder %v244_v3, %v245_v49  ;;  %v265_v62 = vsel %vm264_vm9, %v262_v45, %v263_v51  ;;  %v366_v13 = vsel %vm358_vm10, %v346_v56, %v256_v12 }
 0x2e7   :  { %vm321_vm14 = vcmp.gt.s32.totalorder %v316_v35, %v320_v38  ;;  %vm330_vm15 = vcmp.gt.s32.totalorder %v317_v36, %v329_v40  ;;  %v247_v9 = vsel %vm246_vm5, %v244_v3, %v245_v49  ;;  %v367_v37 = vsel %vm359_vm11, %v355_v60, %v265_v62 }
 0x2e8   :  { %v322_v1 = vsel %vm321_vm14, %v316_v35, %v320_v38  ;;  %v331_v4 = vsel %vm330_vm15, %v317_v36, %v329_v40  ;;  %vm370_vm0 = vcmp.eq.s32.totalorder %v366_v13, %v583_v7  ;;  %vm371_vm1 = vcmp.eq.s32.totalorder %v367_v37, %v583_v7 }
 0x2e9   :  { %v323_v46 = vrot.slane %v322_v1, 2  ;;  %v332_v47 = vrot.slane %v331_v4, 2  ;;  %v363_v40 = vsel %vm359_vm11, 2.0, %v580_v63  ;;  %v362_v3 = vsel %vm358_vm10, 2.0, %v578_v61 }
 0x2eb   :  { %vm324_vm2 = vcmp.gt.s32.totalorder %v322_v1, %v323_v46  ;;  %vm333_vm3 = vcmp.gt.s32.totalorder %v331_v4, %v332_v47 }
 0x2ec   :  { %v325_v52 = vsel %vm324_vm2, %v322_v1, %v323_v46  ;;  %v334_v53 = vsel %vm333_vm3, %v331_v4, %v332_v47  ;;  %vm418_vm3 = vcmask 1040384  }
 0x2ed   :  { %v326_v54 = vrot.slane %v325_v52, 1  ;;  %v335_v55 = vrot.slane %v334_v53, 1 }
 0x2ef   :  { %vm327_vm6 = vcmp.gt.s32.totalorder %v325_v52, %v326_v54  ;;  %vm336_vm7 = vcmp.gt.s32.totalorder %v334_v53, %v335_v55 }
 0x2f0   :  { %v328_v5 = vsel %vm327_vm6, %v325_v52, %v326_v54  ;;  %v337_v6 = vsel %vm336_vm7, %v334_v53, %v335_v55  ;;  %vm411_vm6 = vcmp.lt.f32.partialorder %v363_v40, 0.5  ;;  %vm410_vm7 = vcmp.lt.f32.partialorder %v362_v3, 0.5 }
 0x2f1   :  { %vm356_vm12 = vcmp.ge.s32.totalorder %v328_v5, 0  ;;  %vm357_vm13 = vcmp.ge.s32.totalorder %v337_v6, 0 }
 0x2f2   :  { %v364_v11 = vsel %vm356_vm12, %v328_v5, %v238_v8  ;;  %v365_v59 = vsel %vm357_vm13, %v337_v6, %v247_v9  ;;  %v361_v32 = vsel %vm357_vm13, 2.0, %v576_v58  ;;  %v360_v35 = vsel %vm356_vm12, 2.0, %v574_v57 }
 0x2f3   :  { %vm368_vm14 = vcmp.eq.s32.totalorder %v364_v11, %v583_v7  ;;  %vm369_vm15 = vcmp.eq.s32.totalorder %v365_v59, %v583_v7  ;;  %vm409_vm2 = vcmp.lt.f32.partialorder %v361_v32, 0.5  ;;  %vm408_vm5 = vcmp.lt.f32.partialorder %v360_v35, 0.5 }
 0x2f4   :  { %v380_v39 = vsel %vm368_vm14, %v376_v10, 0  ;;  %v381_v14 = vsel %vm369_vm15, %v376_v10, 0 }
 0x2f5   :  { %v384_v15 = vrot.slane %v380_v39, 4  ;;  %v390_v16 = vrot.slane %v381_v14, 4 }
 0x2f6   :  { %v379_v17 = vpop.permute.xlu1 %378 }
 0x2f7   :  { %v385_v18 = vadd.s32 %v384_v15, %v380_v39  ;;  %v391_v19 = vadd.s32 %v390_v16, %v381_v14  ;;  %v382_v20 = vsel %vm370_vm0, %v379_v17, 0  ;;  %v383_v21 = vsel %vm371_vm1, %v379_v17, 0 }
 0x2f8   :  { %v396_v22 = vrot.slane %v382_v20, 4  ;;  %v402_v23 = vrot.slane %v383_v21, 4 }
 0x2f9   :  { %v386_v24 = vrot.slane %v385_v18, 2  ;;  %v392_v25 = vrot.slane %v391_v19, 2 }
 0x2fa   :  { %v397_v26 = vadd.s32 %v396_v22, %v382_v20  ;;  %v403_v27 = vadd.s32 %v402_v23, %v383_v21 }
 0x2fb   :  { %v387_v29 = vadd.s32 %v386_v24, %v385_v18  ;;  %v393_v0 = vadd.s32 %v392_v25, %v391_v19 }
 0x2fc   :  { %v398_v30 = vrot.slane %v397_v26, 2  ;;  %v404_v31 = vrot.slane %v403_v27, 2 }
 0x2fd   :  { %v388_v33 = vrot.slane %v387_v29, 1  ;;  %v394_v7 = vrot.slane %v393_v0, 1 }
 0x2fe   :  { %v399_v28 = vadd.s32 %v398_v30, %v397_v26  ;;  %v405_v34 = vadd.s32 %v404_v31, %v403_v27 }
 0x2ff   :  { %v389_v36 = vadd.s32 %v388_v33, %v387_v29  ;;  %v395_v38 = vadd.s32 %v394_v7, %v393_v0 }
 0x300   :  { %v400_v41 = vrot.slane %v399_v28, 1  ;;  %v406_v42 = vrot.slane %v405_v34, 1 }
 0x301   :  { %v413_v58 = vsel %vm409_vm2, 0, %v395_v38  ;;  %v412_v44 = vsel %vm408_vm5, 0, %v389_v36 }
 0x302   :  { %v416_v57 = vrot.slane %v413_v58, 7  ;;  %v401_v1 = vadd.s32 %v400_v41, %v399_v28  ;;  %v407_v4 = vadd.s32 %v406_v42, %v405_v34 }
 0x304   :  { %v419_v63 = vsel %vm418_vm3, %v412_v44, %v416_v57  ;;  %v415_v45 = vsel %vm411_vm6, 0, %v407_v4  ;;  %v414_v46 = vsel %vm410_vm7, 0, %v401_v1 }
 0x305   :  { %425 = vst.msk [vmem:[%s641_s2] sm:$0x3] %vm621_vm4, %v419_v63  ;;  %v417_v2 = vrot.slane %v415_v45, 7 }
 0x307   :  { %v420_v61 = vsel %vm418_vm3, %v414_v46, %v417_v2 }
 0x308   :  { %426 = vst.msk [vmem:[%s641_s2 + $0x2] sm:$0x3] %vm621_vm4, %v420_v61 }

</bundles_post_ra>
